<compile_context>
chip_gen: v6e
topology: v6e:2x2x1
jax: 0.10.0
libtpu: 0.0.40
codegen_flags: <defaults>
</compile_context>

<pallas_src>
import functools

import jax
import jax.numpy as jnp
from jax import lax
from jax.experimental import pallas as pl
from jax.experimental.pallas import tpu as pltpu


def _mmd_kernel(src_ref, tgt_ref, loss_ref, total_ref, *,
                batch_size, kernel_mul, kernel_num):
    b = batch_size
    n = 2 * b

    # Concatenate source/target into the VMEM scratch (kept in input dtype so
    # the MXU matmul can run bf16 if the caller passes bf16).
    total_ref[0:b, :] = src_ref[...]
    total_ref[b:n, :] = tgt_ref[...]
    total = total_ref[...]                                     # (N, D)

    # Pairwise squared L2 distances: ||x - y||^2 = ||x||^2 + ||y||^2 - 2 x.y
    # Contraction on the last dim of both operands -> no explicit transpose.
    gram = lax.dot_general(
        total, total,
        dimension_numbers=(((1,), (1,)), ((), ())),
        preferred_element_type=jnp.float32)                    # (N, N) f32

    tot_f32 = total.astype(jnp.float32)
    sq = jnp.sum(tot_f32 * tot_f32, axis=1, keepdims=True)     # (N, 1)
    l2 = jnp.maximum(sq + sq.T - 2.0 * gram, 0.0)              # (N, N)

    # Analytic bandwidth (equals sum(L2) / (n^2 - n) of the reference):
    #   sum_{i,j} ||x_i - x_j||^2 = 2*N*sum_i ||x_i||^2 - 2*||sum_i x_i||^2
    sum_sq = jnp.sum(sq)
    col_sum = jnp.sum(tot_f32, axis=0, keepdims=True)          # (1, D)
    l2_total = jnp.maximum(
        2.0 * float(n) * sum_sq - 2.0 * jnp.sum(col_sum * col_sum), 0.0)
    bandwidth = l2_total / float(n * n - n)
    bandwidth = bandwidth / (kernel_mul ** (kernel_num // 2))

    # Sum of Gaussian kernels over the bandwidth ladder.
    if kernel_mul > 1.0 and float(kernel_mul).is_integer():
        # One exp (largest bandwidth = smallest exponent), then
        #   exp(-l2 / bw_{i-1}) = exp(-l2 / bw_i) ** kernel_mul
        m = int(round(kernel_mul))
        inv_bw_max = 1.0 / (bandwidth * (kernel_mul ** (kernel_num - 1)))
        cur = jnp.exp(-l2 * inv_bw_max)
        kernels = cur
        for _ in range(kernel_num - 1):
            cur = cur * cur if m == 2 else cur ** m
            kernels = kernels + cur
    else:
        # Generic fallback: one exp per bandwidth.
        kernels = None
        for i in range(kernel_num):
            inv_bw = 1.0 / (bandwidth * (kernel_mul ** i))
            term = jnp.exp(-l2 * inv_bw)
            kernels = term if kernels is None else kernels + term

    # loss = mean(XX + YY - XY - YX) over the b x b blocks
    #      = sum(kernels * sign) / b^2, sign = +1 on diagonal blocks, -1 off.
    row = lax.broadcasted_iota(jnp.int32, (n, n), 0)
    col = lax.broadcasted_iota(jnp.int32, (n, n), 1)
    sign = jnp.where((row < b) == (col < b), 1.0, -1.0)
    loss = jnp.sum(kernels * sign) * (1.0 / float(b * b))
    loss_ref[0] = loss


def mmd_loss(source, target, kernel_mul=2.0, kernel_num=5):
    """Pallas-TPU MMD loss. source/target: (batch, features), same shape/dtype."""
    assert source.shape == target.shape
    assert source.dtype == target.dtype
    batch, feat = source.shape
    n = 2 * batch

    kernel = functools.partial(
        _mmd_kernel,
        batch_size=batch,
        kernel_mul=float(kernel_mul),
        kernel_num=int(kernel_num),
    )

    itemsize = jnp.dtype(source.dtype).itemsize
    # gram + l2 + kernels + chain temporaries (f32) + inputs/scratch + headroom
    vmem_bytes = 8 * n * n * 4 + 6 * n * feat * itemsize + (1 << 20)
    vmem_bytes = int(max(16 << 20, min(64 << 20, vmem_bytes)))

    out = pl.pallas_call(
        kernel,
        out_shape=jax.ShapeDtypeStruct((1,), jnp.float32),
        grid=(),
        in_specs=[
            pl.BlockSpec((batch, feat), lambda: (0, 0)),
            pl.BlockSpec((batch, feat), lambda: (0, 0)),
        ],
        out_specs=pl.BlockSpec(memory_space=pltpu.MemorySpace.SMEM),
        scratch_shapes=[pltpu.VMEM((n, feat), source.dtype)],
        compiler_params=pltpu.CompilerParams(vmem_limit_bytes=vmem_bytes),
    )(source, target)
    return out[0]


def _mmd_loss_ref(source, target, kernel_mul=2.0, kernel_num=5):
    """Pure-JAX reference matching the PyTorch module semantics."""
    batch = source.shape[0]
    total = jnp.concatenate([source, target], axis=0).astype(jnp.float32)
    n = total.shape[0]
    diff = total[None, :, :] - total[:, None, :]
    l2 = jnp.sum(diff * diff, axis=2)
    bandwidth = jnp.sum(l2) / (n * n - n)
    bandwidth = bandwidth / (kernel_mul ** (kernel_num // 2))
    kernels = sum(jnp.exp(-l2 / (bandwidth * kernel_mul**i)) for i in range(kernel_num))
    b = batch
    return jnp.mean(
        kernels[:b, :b] + kernels[b:, b:] - kernels[:b, b:] - kernels[b:, :b]
    )


if __name__ == "__main__":
    key = jax.random.PRNGKey(0)
    k1, k2 = jax.random.split(key)
    batch, feat = 8, 32
    source = jax.random.normal(k1, (batch, feat), dtype=jnp.float32)
    target = jax.random.normal(k2, (batch, feat), dtype=jnp.float32) + 0.5

    loss = jax.block_until_ready(mmd_loss(source, target))
    ref = jax.block_until_ready(_mmd_loss_ref(source, target))

    assert jnp.isfinite(loss), "kernel produced non-finite loss"
    err = abs(float(loss) - float(ref))
    assert err <= 1e-4 * max(1.0, abs(float(ref))), (float(loss), float(ref))
    print("KERNEL_OK")
</pallas_src>

<mosaic_0001>
module attributes {stable_mosaic.version = 11 : i64} {
  func.func @_mmd_kernel(%arg0: memref<8x32xf32, #tpu.memory_space<vmem>>, %arg1: memref<8x32xf32, #tpu.memory_space<vmem>>, %arg2: memref<1xf32, #tpu.memory_space<smem>>, %arg3: memref<16x32xf32, #tpu.memory_space<vmem>>) attributes {dimension_semantics = [], scalar_prefetch = 0 : i64, scratch_operands = 1 : i64, tpu.core_type = #tpu.core_type<tc>} {
    %c0 = arith.constant 0 : index
    %c0_0 = arith.constant 0 : index
    %0 = vector.load %arg0[%c0, %c0_0] : memref<8x32xf32, #tpu.memory_space<vmem>>, vector<8x32xf32>
    %c0_1 = arith.constant 0 : index
    %c0_2 = arith.constant 0 : index
    %1 = vector.load %arg3[%c0_1, %c0_2] : memref<16x32xf32, #tpu.memory_space<vmem>>, vector<8x32xf32>
    tpu.vector_store %arg3[%c0_1, %c0_2], %0 {strides = array<i32>} : memref<16x32xf32, #tpu.memory_space<vmem>>, vector<8x32xf32>,
    %c0_3 = arith.constant 0 : index
    %c0_4 = arith.constant 0 : index
    %2 = vector.load %arg1[%c0_3, %c0_4] : memref<8x32xf32, #tpu.memory_space<vmem>>, vector<8x32xf32>
    %c8 = arith.constant 8 : index
    %c0_5 = arith.constant 0 : index
    %3 = vector.load %arg3[%c8, %c0_5] : memref<16x32xf32, #tpu.memory_space<vmem>>, vector<8x32xf32>
    tpu.vector_store %arg3[%c8, %c0_5], %2 {strides = array<i32>} : memref<16x32xf32, #tpu.memory_space<vmem>>, vector<8x32xf32>,
    %c0_6 = arith.constant 0 : index
    %c0_7 = arith.constant 0 : index
    %4 = vector.load %arg3[%c0_6, %c0_7] : memref<16x32xf32, #tpu.memory_space<vmem>>, vector<16x32xf32>
    %cst = arith.constant dense<0.000000e+00> : vector<16x16xf32>
    %5 = tpu.matmul %4, %4, %cst {dimension_numbers = #tpu.dot_dimension_numbers<[1], [1], [0], [0], [0, 0, 1, 0], [], []>} : vector<16x32xf32>, vector<16x32xf32>, vector<16x16xf32> -> vector<16x16xf32>
    %6 = arith.mulf %4, %4 : vector<16x32xf32>
    %cst_8 = arith.constant dense<0.000000e+00> : vector<16xf32>
    %7 = vector.multi_reduction <add>, %6, %cst_8 [1] : vector<16x32xf32> to vector<16xf32>
    %8 = vector.shape_cast %7 : vector<16xf32> to vector<16x1xf32>
    %9 = tpu.transpose %8, [1, 0] : vector<16x1xf32> -> vector<1x16xf32>
    %10 = vector.broadcast %8 : vector<16x1xf32> to vector<16x16xf32>
    %11 = vector.broadcast %9 : vector<1x16xf32> to vector<16x16xf32>
    %12 = arith.addf %10, %11 : vector<16x16xf32>
    %cst_9 = arith.constant 2.000000e+00 : f32
    %13 = vector.broadcast %cst_9 : f32 to vector<16x16xf32>
    %14 = arith.mulf %13, %5 : vector<16x16xf32>
    %15 = arith.subf %12, %14 : vector<16x16xf32>
    %cst_10 = arith.constant 0.000000e+00 : f32
    %16 = vector.broadcast %cst_10 : f32 to vector<16x16xf32>
    %17 = arith.maximumf %15, %16 : vector<16x16xf32>
    %18 = vector.shape_cast %8 : vector<16x1xf32> to vector<1x16x1xf32>
    %cst_11 = arith.constant dense<0.000000e+00> : vector<1xf32>
    %19 = vector.multi_reduction <add>, %18, %cst_11 [1, 2] : vector<1x16x1xf32> to vector<1xf32>
    %20 = vector.shape_cast %19 : vector<1xf32> to vector<1x1x1xf32>
    %21 = vector.extract %20[0, 0, 0] : f32 from vector<1x1x1xf32>
    %cst_12 = arith.constant dense<0.000000e+00> : vector<32xf32>
    %22 = vector.multi_reduction <add>, %4, %cst_12 [0] : vector<16x32xf32> to vector<32xf32>
    %23 = vector.shape_cast %22 : vector<32xf32> to vector<1x32xf32>
    %cst_13 = arith.constant 3.200000e+01 : f32
    %24 = arith.mulf %cst_13, %21 : f32
    %25 = arith.mulf %23, %23 : vector<1x32xf32>
    %26 = vector.shape_cast %25 : vector<1x32xf32> to vector<1x1x32xf32>
    %cst_14 = arith.constant dense<0.000000e+00> : vector<1xf32>
    %27 = vector.multi_reduction <add>, %26, %cst_14 [1, 2] : vector<1x1x32xf32> to vector<1xf32>
    %28 = vector.shape_cast %27 : vector<1xf32> to vector<1x1x1xf32>
    %29 = vector.extract %28[0, 0, 0] : f32 from vector<1x1x1xf32>
    %cst_15 = arith.constant 2.000000e+00 : f32
    %30 = arith.mulf %cst_15, %29 : f32
    %31 = arith.subf %24, %30 : f32
    %cst_16 = arith.constant 0.000000e+00 : f32
    %32 = arith.maximumf %31, %cst_16 : f32
    %cst_17 = arith.constant 2.400000e+02 : f32
    %33 = arith.divf %32, %cst_17 : f32
    %cst_18 = arith.constant 4.000000e+00 : f32
    %34 = arith.divf %33, %cst_18 : f32
    %cst_19 = arith.constant 1.600000e+01 : f32
    %35 = arith.mulf %34, %cst_19 : f32
    %cst_20 = arith.constant 1.000000e+00 : f32
    %36 = arith.divf %cst_20, %35 : f32
    %cst_21 = arith.constant 0.000000e+00 : f32
    %37 = vector.broadcast %cst_21 : f32 to vector<16x16xf32>
    %38 = arith.subf %37, %17 : vector<16x16xf32>
    %39 = vector.broadcast %36 : f32 to vector<16x16xf32>
    %40 = arith.mulf %38, %39 : vector<16x16xf32>
    %41 = math.exp %40 : vector<16x16xf32>
    %42 = arith.mulf %41, %41 : vector<16x16xf32>
    %43 = arith.addf %41, %42 : vector<16x16xf32>
    %44 = arith.mulf %42, %42 : vector<16x16xf32>
    %45 = arith.addf %43, %44 : vector<16x16xf32>
    %46 = arith.mulf %44, %44 : vector<16x16xf32>
    %47 = arith.addf %45, %46 : vector<16x16xf32>
    %48 = arith.mulf %46, %46 : vector<16x16xf32>
    %49 = arith.addf %47, %48 : vector<16x16xf32>
    %50 = tpu.iota {dimensions = array<i32: 0>} : vector<16x16xi32>
    %51 = tpu.iota {dimensions = array<i32: 1>} : vector<16x16xi32>
    %c8_i32 = arith.constant 8 : i32
    %52 = vector.broadcast %c8_i32 : i32 to vector<16x16xi32>
    %53 = arith.cmpi slt, %50, %52 : vector<16x16xi32>
    %c8_i32_22 = arith.constant 8 : i32
    %54 = vector.broadcast %c8_i32_22 : i32 to vector<16x16xi32>
    %55 = arith.cmpi slt, %51, %54 : vector<16x16xi32>
    %56 = arith.xori %53, %55 : vector<16x16xi1>
    %cst_23 = arith.constant dense<true> : vector<16x16xi1>
    %57 = arith.xori %56, %cst_23 : vector<16x16xi1>
    %cst_24 = arith.constant 1.000000e+00 : f32
    %cst_25 = arith.constant -1.000000e+00 : f32
    %58 = vector.broadcast %cst_24 : f32 to vector<16x16xf32>
    %59 = vector.broadcast %cst_25 : f32 to vector<16x16xf32>
    %60 = arith.select %57, %58, %59 : vector<16x16xi1>, vector<16x16xf32>
    %61 = arith.mulf %49, %60 : vector<16x16xf32>
    %62 = vector.shape_cast %61 : vector<16x16xf32> to vector<1x16x16xf32>
    %cst_26 = arith.constant dense<0.000000e+00> : vector<1xf32>
    %63 = vector.multi_reduction <add>, %62, %cst_26 [1, 2] : vector<1x16x16xf32> to vector<1xf32>
    %64 = vector.shape_cast %63 : vector<1xf32> to vector<1x1x1xf32>
    %65 = vector.extract %64[0, 0, 0] : f32 from vector<1x1x1xf32>
    %cst_27 = arith.constant 1.562500e-02 : f32
    %66 = arith.mulf %65, %cst_27 : f32
    %c0_28 = arith.constant 0 : index
    %67 = memref.load %arg2[%c0_28] : memref<1xf32, #tpu.memory_space<smem>>
    memref.store %66, %arg2[%c0_28] : memref<1xf32, #tpu.memory_space<smem>>
    return
  }
}

</mosaic_0001>

<bundles_post_ra>
// kernel: tpu_custom_call.1
= control target key start
LH: loop header
LB: loop body
LE: loop exit
PB: predicated region body
PF: predicated region fallthrough
CT: control target
= control target key end

     0   :  { %7 = vsyncpa [#allocation4], 0  ;;  %s430_s0 = inlined_call_operand.hbm [shape: f32[8,32], index: 0, kind: input, shape index: {}]   ;;  %s431_s1 = inlined_call_operand.hbm [shape: f32[8,32], index: 1, kind: input, shape index: {}]   ;;  %s432_s2 = inlined_call_operand.hbm [shape: f32[1], index: 2, kind: output, shape index: {}]  }
   0x1   :  { %8 = vsyncpa [#allocation7], 0 }
   0x2   :  { %9 = vsyncpa [#allocation5], 0  ;;  %s386_s9 = smov [#allocation3]   ;;  %s387_s11 = smov [#allocation6]  }
   0x3   :  { %s16_s10 = sshll.u32 %s386_s9, 4  ;;  %s26_s12 = sshll.u32 %s387_s11, 4  ;;  %s17_s10 = int_to_ptr.vmem [resolvable:$true] %s16_s10  ;;  %s27_s12 = int_to_ptr.vmem [resolvable:$true] %s26_s12 }
   0x4   :  { %s340_s13 = scalar_lea.vmem %s17_s10, 128  ;;  %p345_p1 = scmp.lt.s32.totalorder %s17_s10, %s17_s10 }
   0x5   :  { %p341_p0 = scmp.ne.s32.totalorder %s17_s10, %s340_s13  ;;  %p346_p2 = scmp.lt.s32.totalorder %s340_s13, %s340_s13 }
   0x7   :  { %p347_p3 = por %p346_p2, %p345_p1 }
   0x9   :  { %p348_p4 = pnand %p347_p3, %p341_p0 }
   0xb   :  { %351 = shalt.err (!%p348_p4)
}
   0xc   :  { %19 = dma.hbm_to_vmem [thread:$0]  %s430_s0, 128, %s17_s10, [#allocation4]  }
   0xd   :  { %s360_s16 = scalar_lea.vmem %s27_s12, 128  ;;  %p365_p6 = scmp.lt.s32.totalorder %s27_s12, %s27_s12 }
   0xe   :  { %p361_p5 = scmp.ne.s32.totalorder %s27_s12, %s360_s16  ;;  %p366_p7 = scmp.lt.s32.totalorder %s360_s16, %s360_s16 }
  0x10   :  { %p367_p8 = por %p366_p7, %p365_p6 }
  0x12   :  { %p368_p9 = pnand %p367_p8, %p361_p5 }
  0x14   :  { %371 = shalt.err (!%p368_p9)
}
  0x15   :  { %29 = dma.hbm_to_vmem [thread:$0]  %s431_s1, 128, %s27_s12, [#allocation7]  }
  0x16   :  { %380 = dma.done.wait [#allocation4], 128  }
  0x17   :  { %381 = vsyncadd [#allocation4], 4294967168 }
  0x18   :  { %382 = dma.done.wait [#allocation7], 128  }
  0x19   :  { %383 = vsyncadd [#allocation7], 4294967168  ;;  %vm37_vm0 = vcmask 261120   ;;  %v36_v0 = vld [vmem:[#allocation3] sm:$0xff]  ;;  %v39_v1 = vld [vmem:[#allocation6] sm:$0xff]  ;;  %vm176_vm1 = vcmask 7168   ;;  %v164_v40 = vlaneseq }
  0x1a   :  { %38 = vst.msk [vmem:[#allocation2] sm:$0xff] %vm37_vm0, %v36_v0  ;;  %40 = vst.msk [vmem:[#allocation2 + $0x8] sm:$0xff] %vm37_vm0, %v39_v1  ;;  %vm200_vm2 = vcmask 253952   ;;  %s388_s22 = smov 0.0   ;;  %vm389_vm4 = vmmov 1   ;;  %vm265_vm8 = vcmask 130048  }
  0x1b   :  { %v165_v41 = vshrl.u32 %v164_v40, 7  ;;  %v253_v62 = vand.u32 127, %v164_v40  ;;  %s391_s30 = smov [#allocation8]  }
  0x1d   :  { %v166_v42 = vsub.s32 0, %v165_v41  ;;  %vm256_vm3 = vcmp.lt.s32.totalorder %v253_v62, 8 }
  0x1e   :  { %vm257_vm5 = vmxor %vm389_vm4, %vm256_vm3 }
  0x1f   :  { %vm259_vm6 = vmxor %vm257_vm5, %vm389_vm4 }
  0x20   :  { %vm260_vm7 = vmxor %vm256_vm3, %vm389_vm4 }
  0x21   :  { %v41_v2 = vld [vmem:[#allocation2] sm:$0xff]  ;;  %v42_v3 = vld [vmem:[#allocation2 + $0x8] sm:$0xff] }
  0x22   :  { %v124_v4 = vmul.f32 %v41_v2, %v41_v2  ;;  %v125_v5 = vmul.f32 %v42_v3, %v42_v3  ;;  %304 = vmatprep.subr.msk.mxu0 %vm37_vm0, %v42_v3  ;;  %308 = vmatprep.mubr.msk.f32.mxu0 %vm37_vm0, %v41_v2  ;;  %v189_v8 = vsel %vm37_vm0, %v41_v2, 0.0  ;;  %v190_v9 = vsel %vm37_vm0, %v42_v3, 0.0 }
  0x23   :  { %305 = vmatpush3.xpose.msk.msra.mxu0 %vm37_vm0, %v42_v3  ;;  %v191_v10 = vadd.f32 %v190_v9, %v189_v8 }
  0x24   :  { %v126_v6 = vsel %vm37_vm0, %v124_v4, 0.0  ;;  %306 = vmatprep.subr.msk.mxu0 %vm37_vm0, %v41_v2  ;;  %v129_v7 = vsel %vm37_vm0, %v125_v5, 0.0 }
  0x25   :  { %127 = vadd.xlane.f32.xlu0 %v126_v6  ;;  %v192_v11 = vrot.slane %v191_v10, 4 }
  0x27   :  { %307 = vmatpush3.xpose.msk.msra.mxu0 %vm37_vm0, %v41_v2  ;;  %v193_v12 = vadd.f32 %v192_v11, %v191_v10 }
  0x29   :  { %130 = vadd.xlane.f32.xlu0 %v129_v7  ;;  %v194_v13 = vrot.slane %v193_v12, 2 }
  0x2a   :  { %309 = vmatmul.mubr.msk.f32.vlgmr.msra.gmra.mxu0 %vm37_vm0, %v42_v3 }
  0x2b   :  { %v195_v14 = vadd.f32 %v194_v13, %v193_v12 }
  0x2d   :  { %v196_v15 = vrot.slane %v195_v14, 1 }
  0x2f   :  { %v197_v17 = vadd.f32 %v196_v15, %v195_v14  ;;  %v390_v15 = vmov -1.0  }
  0x31   :  { %v199_v21 = vmul.f32 %v197_v17, %v197_v17 }
  0x33   :  { %v201_v23 = vsel %vm200_vm2, %v199_v21, 0.0 }
  0xae   :  { %v128_v16 = vpop.xlane.xlu0 %127 }
  0xaf   :  { %132 = vxpose.xlu0.b32.start [1/2] (short) (narrow) %v128_v16, 8  ;;  %v177_v19 = vsel %vm176_vm1, %v128_v16, 0.0 }
  0xb2   :  { %v131_v18 = vpop.xlane.xlu0 %130 }
  0xb3   :  { %133 = vxpose.xlu0.b32.end [2/2] (short) (narrow) %v131_v18, 8  ;;  %v178_v20 = vsel %vm176_vm1, %v131_v18, 0.0 }
  0xb4   :  { %v179_v22 = vadd.f32 %v178_v20, %v177_v19 }
  0xb6   :  { %180 = vadd.xlane.f32.xlu1 %v179_v22 }
  0xba   :  { %202 = vadd.xlane.f32.xlu1 %v201_v23 }
  0xea   :  { %v310_v44 = vpop.f32.mrf.mxu0 }
  0xeb   :  { %v171_v49 = vmul.f32 2.0, %v310_v44 }
  0xec   :  { %v115_v46 = vpop.f32.mrf.mxu0 }
  0xed   :  { %v170_v50 = vmul.f32 2.0, %v115_v46 }
 0x12b   :  { %v148_v43 = vpop.trf.xlu0 }
 0x12c   :  { %v167_v45 = vrot.slane %v148_v43, %v166_v42 }
 0x12e   :  { %v168_v47 = vadd.f32 %v167_v45, %v128_v16  ;;  %v169_v48 = vadd.f32 %v167_v45, %v131_v18  ;;  %v261_v16 = vsel %vm259_vm6, 1.0, %v390_v15  ;;  %v262_v18 = vsel %vm260_vm7, 1.0, %v390_v15 }
 0x130   :  { %v173_v51 = vsub.f32 %v169_v48, %v171_v49  ;;  %v172_v52 = vsub.f32 %v168_v47, %v170_v50 }
 0x132   :  { %v175_v53 = vmax.f32 %v173_v51, 0.0  ;;  %v174_v54 = vmax.f32 %v172_v52, 0.0 }
 0x134   :  { %v224_v55 = vsub.f32 0.0, %v174_v54  ;;  %v225_v56 = vsub.f32 0.0, %v175_v53 }
 0x13f   :  { %v181_v24 = vpop.xlane.xlu1 %180 }
 0x140   :  { %v182_v25 = vrot.slane %v181_v24, 4 }
 0x142   :  { %v183_v26 = vadd.f32 %v182_v25, %v181_v24 }
 0x143   :  { %v203_v27 = vpop.xlane.xlu1 %202 }
 0x144   :  { %v184_v28 = vrot.slane %v183_v26, 2  ;;  %v204_v29 = vrot.slane %v203_v27, 4 }
 0x146   :  { %v205_v30 = vadd.f32 %v204_v29, %v203_v27  ;;  %v185_v31 = vadd.f32 %v184_v28, %v183_v26 }
 0x148   :  { %v206_v32 = vrot.slane %v205_v30, 2  ;;  %v186_v33 = vrot.slane %v185_v31, 1 }
 0x14a   :  { %v187_v34 = vadd.f32 %v186_v33, %v185_v31  ;;  %v207_v35 = vadd.f32 %v206_v32, %v205_v30 }
 0x14c   :  { %311 = vpush %v187_v34  ;;  %v208_v36 = vrot.slane %v207_v35, 1 }
 0x14e   :  { %v209_v37 = vadd.f32 %v208_v36, %v207_v35 }
 0x150   :  { %313 = vpush %v209_v37 }
 0x17d   :  { %s312_s0 = spop %311 }
 0x17e   :  { %s198_s1 = smul.f32 32.0, %s312_s0 }
 0x181   :  { %s314_s19 = spop %313 }
 0x182   :  { %s211_s20 = smul.f32 2.0, %s314_s19 }
 0x184   :  { %s212_s21 = ssub.f32 %s198_s1, %s211_s20 }
 0x186   :  { %s213_s23 = smax.f32 %s388_s22, %s212_s21 }
 0x187   :  { %s216_s24 = smul.f32 0.004166667, %s213_s23 }
 0x189   :  { %s219_s25 = smul.f32 0.25, %s216_s24 }
 0x18b   :  { %s220_s26 = smul.f32 16.0, %s219_s25 }
 0x18d   :  { %v221_v38 = vstv %s220_s26 }
 0x18e   :  { %326 = vrcp.f32 %v221_v38 }
 0x19b   :  { %v327_v39 = vpop.eup %326 }
 0x19c   :  { %315 = vpush %v327_v39 }
 0x1cd   :  { %s316_s27 = spop %315 }
 0x1ce   :  { %v226_v57 = vstv %s316_s27 }
 0x1cf   :  { %v227_v58 = vmul.f32 %v226_v57, %v224_v55  ;;  %v228_v59 = vmul.f32 %v226_v57, %v225_v56 }
 0x1d1   :  { %v229_v60 = vmul.f32 1.442695, %v227_v58  ;;  %v231_v61 = vmul.f32 1.442695, %v228_v59 }
 0x1d3   :  { %328 = vpow2.f32 %v229_v60 }
 0x1d4   :  { %330 = vpow2.f32 %v231_v61 }
 0x1e0   :  { %v329_v63 = vpop.eup %328 }
 0x1e1   :  { %v331_v0 = vpop.eup %330  ;;  %v233_v1 = vmul.f32 %v329_v63, %v329_v63 }
 0x1e2   :  { %v234_v2 = vmul.f32 %v331_v0, %v331_v0 }
 0x1e3   :  { %v235_v3 = vadd.f32 %v329_v63, %v233_v1  ;;  %v237_v4 = vmul.f32 %v233_v1, %v233_v1 }
 0x1e4   :  { %v236_v5 = vadd.f32 %v331_v0, %v234_v2  ;;  %v238_v6 = vmul.f32 %v234_v2, %v234_v2 }
 0x1e5   :  { %v239_v7 = vadd.f32 %v237_v4, %v235_v3  ;;  %v241_v8 = vmul.f32 %v237_v4, %v237_v4 }
 0x1e6   :  { %v240_v9 = vadd.f32 %v238_v6, %v236_v5  ;;  %v242_v10 = vmul.f32 %v238_v6, %v238_v6 }
 0x1e7   :  { %v243_v11 = vadd.f32 %v241_v8, %v239_v7  ;;  %v245_v12 = vmul.f32 %v241_v8, %v241_v8 }
 0x1e8   :  { %v244_v13 = vadd.f32 %v242_v10, %v240_v9  ;;  %v246_v14 = vmul.f32 %v242_v10, %v242_v10 }
 0x1e9   :  { %v247_v17 = vadd.f32 %v245_v12, %v243_v11 }
 0x1ea   :  { %v248_v19 = vadd.f32 %v246_v14, %v244_v13 }
 0x1eb   :  { %v263_v20 = vmul.f32 %v261_v16, %v247_v17 }
 0x1ec   :  { %v264_v21 = vmul.f32 %v262_v18, %v248_v19 }
 0x1ed   :  { %v266_v22 = vsel %vm265_vm8, %v263_v20, 0.0 }
 0x1ee   :  { %v267_v23 = vsel %vm265_vm8, %v264_v21, 0.0 }
 0x1ef   :  { %v268_v24 = vadd.f32 %v267_v23, %v266_v22 }
 0x1f1   :  { %269 = vadd.xlane.f32.xlu1 %v268_v24 }
 0x27a   :  { %v270_v25 = vpop.xlane.xlu1 %269 }
 0x27b   :  { %v271_v26 = vrot.slane %v270_v25, 4 }
 0x27d   :  { %v272_v27 = vadd.f32 %v271_v26, %v270_v25 }
 0x27f   :  { %v273_v28 = vrot.slane %v272_v27, 2 }
 0x281   :  { %v274_v29 = vadd.f32 %v273_v28, %v272_v27 }
 0x283   :  { %v275_v30 = vrot.slane %v274_v29, 1 }
 0x285   :  { %v276_v31 = vadd.f32 %v275_v30, %v274_v29 }
 0x287   :  { %317 = vpush %v276_v31 }
 0x2b8   :  { %s318_s28 = spop %317 }
 0x2b9   :  { %s278_s29 = smul.f32 0.015625, %s318_s28 }
 0x2bb   :  { %280 = sst [smem:[#allocation8]] %s278_s29 }
 0x2bc   :  { %288 = dma.smem_to_hbm %s391_s30, 16, %s432_s2, [#allocation5]  }
 0x2bd   :  { %384 = dma.done.wait [#allocation5], 16  }
 0x2be   :  { %385 = vsyncadd [#allocation5], 4294967280 }
 0x2bf   :  { %292 = sfence }
 0x2c0   :  { %293 = vsyncpa [#allocation4], 1 }
 0x2c1   :  { %294 = vsyncpa [#allocation7], 1 }
 0x2c2   :  { %295 = vsyncpa [#allocation5], 1 }

</bundles_post_ra>
